<compile_context>
chip_gen: v7x
topology: tpu7x:2x2x1
jax: 0.10.0
libtpu: 0.0.40
codegen_flags: <defaults>
</compile_context>

<pallas_src>
import jax
import jax.numpy as jnp
from jax import lax
from jax.experimental import pallas as pl
from jax.experimental.pallas import tpu as pltpu


def mlp_kernel(x_ref, w1_ref, b1_ref, w2_ref, b2_ref, w3_ref,
               b3_ref, alpha_ref, o_ref):
    x = x_ref[...]                                                   # (TB, 50)

    # fc1 + ReLU (MXU, f32 accumulate)
    a1 = jnp.dot(x, w1_ref[...], preferred_element_type=jnp.float32) + b1_ref[...]
    h1 = jnp.maximum(a1, 0.0)

    # Dropout(0.2): identity at inference time (see TODO at top of file).

    # fc2 + PReLU (single shared alpha, scalar read from SMEM)
    a2 = jnp.dot(h1, w2_ref[...], preferred_element_type=jnp.float32) + b2_ref[...]
    alpha = alpha_ref[0, 0]
    h2 = jnp.where(a2 > 0.0, a2, alpha * a2)

    # out (100 -> 1): w3_row (1,100) contracted with h2 (TB,100) over the feature
    # axis of both operands -> (1, TB).  Output is already lane-dense (batch on
    # lanes), so the store is an unmasked vst instead of a lane-sparse (TB, 1).
    a3 = lax.dot_general(
        w3_ref[...], h2,
        dimension_numbers=(((1,), (1,)), ((), ())),
        preferred_element_type=jnp.float32,
    ) + b3_ref[0, 0]                                                 # (1, TB)

    # Sigmoid: exp and approximate reciprocal both go to the EUP slot.
    o_ref[...] = pl.reciprocal(1.0 + jnp.exp(-a3), approx=True)


def _round_up(n, m):
    return ((n + m - 1) // m) * m


def reference_forward(x, params):
    """Pure-JAX reference / small-batch fallback path."""
    w1, b1, w2, b2, w3, b3, alpha = params
    h1 = jnp.maximum(x @ w1 + b1, 0.0)
    a2 = h1 @ w2 + b2
    h2 = jnp.where(a2 > 0.0, a2, alpha[0, 0] * a2)
    a3 = h2 @ w3 + b3
    return jax.nn.sigmoid(a3)


def net_forward(x, params, *, block_b=4096, small_batch_threshold=1024,
                force_pallas=False):
    """Forward pass. x: (B, 50) -> (B, 1) float32.

    Small batches dispatch to the pure-JAX path (Pallas only pays off once the
    batch grid amortizes the fixed per-call / per-step overhead).
    """
    w1, b1, w2, b2, w3, b3, alpha = params
    B, f_in = x.shape
    h1_dim = w1.shape[1]
    h2_dim = w2.shape[1]

    if (not force_pallas) and B <= small_batch_threshold:
        return reference_forward(x, params).astype(jnp.float32)

    # ---- Tile selection -----------------------------------------------------
    # tb must be a multiple of 128 (sublane/lane rules + fills the MXU M-dim).
    x_bytes = jnp.dtype(x.dtype).itemsize
    # Per-row VMEM estimate: double-buffered x, double-buffered (1,TB) output,
    # and the f32 a1/h1/a2/h2 intermediates.
    per_row_bytes = 2 * f_in * x_bytes + 2 * 4 + (2 * h1_dim + 2 * h2_dim) * 4
    vmem_budget = 20 << 20                      # safe on v7x (64 MiB phys / 32 MiB scoped)
    max_tb = max(128, (vmem_budget // per_row_bytes) // 128 * 128)

    tb_cap = min(_round_up(max(block_b, 128), 128), max_tb)
    b_pad128 = _round_up(max(B, 1), 128)
    if b_pad128 >= 256:
        # Keep at least 2 grid steps so the "parallel" batch axis can shard
        # across both v7x TensorCores (harmless ~0.35 us extra step elsewhere).
        tb_two_steps = _round_up(pl.cdiv(b_pad128, 2), 128)
        tb = min(tb_cap, tb_two_steps)
    else:
        tb = min(tb_cap, b_pad128)

    b_pad = _round_up(B, tb)
    if b_pad != B:
        x = jnp.pad(x, ((0, b_pad - B), (0, 0)))
    grid_b = b_pad // tb

    w3_row = jnp.reshape(w3, (1, h2_dim))       # (1, 100) row for the last layer

    # ---- VMEM limit + cost hints --------------------------------------------
    weight_bytes = (w1.size * w1.dtype.itemsize + b1.size * 4 +
                    w2.size * w2.dtype.itemsize + b2.size * 4 +
                    w3.size * w3.dtype.itemsize + b3.size * 4)
    est_vmem = tb * per_row_bytes + 2 * weight_bytes + (64 << 10)
    vmem_limit = int(min(max(2 * est_vmem, 16 << 20), 40 << 20))

    cost = pl.CostEstimate(
        flops=2 * b_pad * (f_in * h1_dim + h1_dim * h2_dim + h2_dim * 1),
        transcendentals=2 * b_pad,                                   # exp + reciprocal
        bytes_accessed=b_pad * (f_in * x_bytes + 4) + weight_bytes,
    )

    out = pl.pallas_call(
        mlp_kernel,
        out_shape=jax.ShapeDtypeStruct((grid_b, tb), jnp.float32),
        grid=(grid_b,),
        in_specs=[
            pl.BlockSpec((tb, f_in), lambda i: (i, 0)),          # x: batch-tiled, pipelined
            pl.BlockSpec((f_in, h1_dim), lambda i: (0, 0)),      # w1: VMEM-resident
            pl.BlockSpec((1, h1_dim), lambda i: (0, 0)),         # b1: VMEM-resident
            pl.BlockSpec((f_in, h2_dim), lambda i: (0, 0)),      # w2: VMEM-resident
            pl.BlockSpec((1, h2_dim), lambda i: (0, 0)),         # b2: VMEM-resident
            pl.BlockSpec((1, h2_dim), lambda i: (0, 0)),         # w3 as a (1, 100) row
            pl.BlockSpec(memory_space=pltpu.MemorySpace.SMEM),   # b3 scalar
            pl.BlockSpec(memory_space=pltpu.MemorySpace.SMEM),   # alpha scalar
        ],
        out_specs=pl.BlockSpec((1, tb), lambda i: (i, 0)),       # lane-dense output row
        compiler_params=pltpu.CompilerParams(
            dimension_semantics=("parallel",),                   # megacore-shard the batch
            vmem_limit_bytes=vmem_limit),
        cost_estimate=cost,
    )(x, w1, b1, w2, b2, w3_row, b3, alpha)

    # (grid_b, tb) lane-dense slab -> (B, 1)
    return out.reshape(b_pad, 1)[:B]


def init_params(key):
    """Deterministic init matching the PyTorch layer shapes."""
    ks = jax.random.split(key, 7)

    def linear(kw, kb, fan_in, fan_out):
        # PyTorch nn.Linear default: U(-1/sqrt(fan_in), 1/sqrt(fan_in))
        bound = 1.0 / jnp.sqrt(fan_in)
        w = jax.random.uniform(kw, (fan_in, fan_out), jnp.float32, -bound, bound)
        b = jax.random.uniform(kb, (1, fan_out), jnp.float32, -bound, bound)
        return w, b

    w1, b1 = linear(ks[0], ks[1], 50, 50)        # fc1
    w2, b2 = linear(ks[2], ks[3], 50, 100)       # fc2
    w3, b3 = linear(ks[4], ks[5], 100, 1)        # out
    alpha = jnp.full((1, 1), 0.25, jnp.float32)  # PReLU default init
    return (w1, b1, w2, b2, w3, b3, alpha)


if __name__ == "__main__":
    key = jax.random.PRNGKey(0)
    k_params, k_x = jax.random.split(key)
    params = init_params(k_params)

    # Matches the PyTorch spec: inputs = torch.randn(100, 50).
    x = jax.random.normal(k_x, (100, 50), jnp.float32)
    y_ref = reference_forward(x, params)

    # 1) Force the Pallas path at B=100 (single 128-row tile) for correctness.
    y = jax.block_until_ready(net_forward(x, params, force_pallas=True))
    assert y.shape == (100, 1)
    assert jnp.allclose(y, y_ref, atol=2e-3, rtol=2e-3), \
        float(jnp.max(jnp.abs(y - y_ref)))

    # 2) Default dispatch: small batch takes the pure-JAX fallback path.
    y_disp = jax.block_until_ready(net_forward(x, params))
    assert y_disp.shape == (100, 1)
    assert jnp.allclose(y_disp, y_ref, atol=2e-3, rtol=2e-3)

    # 3) Larger ragged batch: exercises padding, >=2-step grid ("parallel" axis
    #    shards across v7x TensorCores) and the VMEM-capped tile selection.
    x_big = jax.random.normal(k_x, (4133, 50), jnp.float32)
    y_big = jax.block_until_ready(net_forward(x_big, params))
    y_big_ref = reference_forward(x_big, params)
    assert y_big.shape == (4133, 1)
    assert jnp.allclose(y_big, y_big_ref, atol=2e-3, rtol=2e-3), \
        float(jnp.max(jnp.abs(y_big - y_big_ref)))

    print("KERNEL_OK")
</pallas_src>

<mosaic_0001>
module attributes {stable_mosaic.version = 11 : i64} {
  func.func @mlp_kernel(%arg0: i32, %arg1: memref<128x50xf32, #tpu.memory_space<vmem>>, %arg2: memref<50x50xf32, #tpu.memory_space<vmem>>, %arg3: memref<1x50xf32, #tpu.memory_space<vmem>>, %arg4: memref<50x100xf32, #tpu.memory_space<vmem>>, %arg5: memref<1x100xf32, #tpu.memory_space<vmem>>, %arg6: memref<1x100xf32, #tpu.memory_space<vmem>>, %arg7: memref<1x1xf32, #tpu.memory_space<smem>>, %arg8: memref<1x1xf32, #tpu.memory_space<smem>>, %arg9: memref<1x128xf32, #tpu.memory_space<vmem>>) attributes {dimension_semantics = [#tpu.dimension_semantics<parallel>], iteration_bounds = array<i64: 1>, scalar_prefetch = 0 : i64, scratch_operands = 0 : i64, tpu.core_type = #tpu.core_type<tc>, window_params = [{transform_indices = @transform_0, window_bounds = array<i64: 128, 50>}, {pipeline_mode = #tpu.pipeline_mode<synchronous>, transform_indices = @transform_1, window_bounds = array<i64: 50, 50>}, {pipeline_mode = #tpu.pipeline_mode<synchronous>, transform_indices = @transform_2, window_bounds = array<i64: 1, 50>}, {pipeline_mode = #tpu.pipeline_mode<synchronous>, transform_indices = @transform_3, window_bounds = array<i64: 50, 100>}, {pipeline_mode = #tpu.pipeline_mode<synchronous>, transform_indices = @transform_4, window_bounds = array<i64: 1, 100>}, {pipeline_mode = #tpu.pipeline_mode<synchronous>, transform_indices = @transform_5, window_bounds = array<i64: 1, 100>}, {transform_indices = @transform_6, window_bounds = array<i64: 1, 1>}, {transform_indices = @transform_7, window_bounds = array<i64: 1, 1>}, {transform_indices = @transform_8, window_bounds = array<i64: 1, 128>}]} {
    %c0 = arith.constant 0 : index
    %c0_0 = arith.constant 0 : index
    %0 = vector.load %arg1[%c0, %c0_0] : memref<128x50xf32, #tpu.memory_space<vmem>>, vector<128x50xf32>
    %c0_1 = arith.constant 0 : index
    %c0_2 = arith.constant 0 : index
    %1 = vector.load %arg2[%c0_1, %c0_2] : memref<50x50xf32, #tpu.memory_space<vmem>>, vector<50x50xf32>
    %cst = arith.constant dense<0.000000e+00> : vector<128x50xf32>
    %2 = tpu.matmul %0, %1, %cst {dimension_numbers = #tpu.dot_dimension_numbers<[1], [0], [0], [1], [0, 0, 1, 1], [], []>} : vector<128x50xf32>, vector<50x50xf32>, vector<128x50xf32> -> vector<128x50xf32>
    %c0_3 = arith.constant 0 : index
    %c0_4 = arith.constant 0 : index
    %3 = vector.load %arg3[%c0_3, %c0_4] : memref<1x50xf32, #tpu.memory_space<vmem>>, vector<1x50xf32>
    %4 = vector.broadcast %3 : vector<1x50xf32> to vector<128x50xf32>
    %5 = arith.addf %2, %4 : vector<128x50xf32>
    %cst_5 = arith.constant 0.000000e+00 : f32
    %6 = vector.broadcast %cst_5 : f32 to vector<128x50xf32>
    %7 = arith.maximumf %5, %6 : vector<128x50xf32>
    %c0_6 = arith.constant 0 : index
    %c0_7 = arith.constant 0 : index
    %8 = vector.load %arg4[%c0_6, %c0_7] : memref<50x100xf32, #tpu.memory_space<vmem>>, vector<50x100xf32>
    %cst_8 = arith.constant dense<0.000000e+00> : vector<128x100xf32>
    %9 = tpu.matmul %7, %8, %cst_8 {dimension_numbers = #tpu.dot_dimension_numbers<[1], [0], [0], [1], [0, 0, 1, 1], [], []>} : vector<128x50xf32>, vector<50x100xf32>, vector<128x100xf32> -> vector<128x100xf32>
    %c0_9 = arith.constant 0 : index
    %c0_10 = arith.constant 0 : index
    %10 = vector.load %arg5[%c0_9, %c0_10] : memref<1x100xf32, #tpu.memory_space<vmem>>, vector<1x100xf32>
    %11 = vector.broadcast %10 : vector<1x100xf32> to vector<128x100xf32>
    %12 = arith.addf %9, %11 : vector<128x100xf32>
    %c0_11 = arith.constant 0 : index
    %c0_12 = arith.constant 0 : index
    %13 = memref.load %arg8[%c0_11, %c0_12] : memref<1x1xf32, #tpu.memory_space<smem>>
    %cst_13 = arith.constant 0.000000e+00 : f32
    %14 = vector.broadcast %cst_13 : f32 to vector<128x100xf32>
    %15 = arith.cmpf ogt, %12, %14 : vector<128x100xf32>
    %16 = vector.broadcast %13 : f32 to vector<128x100xf32>
    %17 = arith.mulf %16, %12 : vector<128x100xf32>
    %18 = arith.select %15, %12, %17 : vector<128x100xi1>, vector<128x100xf32>
    %c0_14 = arith.constant 0 : index
    %c0_15 = arith.constant 0 : index
    %19 = vector.load %arg6[%c0_14, %c0_15] : memref<1x100xf32, #tpu.memory_space<vmem>>, vector<1x100xf32>
    %cst_16 = arith.constant dense<0.000000e+00> : vector<1x128xf32>
    %20 = tpu.matmul %19, %18, %cst_16 {dimension_numbers = #tpu.dot_dimension_numbers<[1], [1], [0], [0], [0, 0, 1, 0], [], []>} : vector<1x100xf32>, vector<128x100xf32>, vector<1x128xf32> -> vector<1x128xf32>
    %c0_17 = arith.constant 0 : index
    %c0_18 = arith.constant 0 : index
    %21 = memref.load %arg7[%c0_17, %c0_18] : memref<1x1xf32, #tpu.memory_space<smem>>
    %22 = vector.broadcast %21 : f32 to vector<1x128xf32>
    %23 = arith.addf %20, %22 : vector<1x128xf32>
    %cst_19 = arith.constant 0.000000e+00 : f32
    %24 = vector.broadcast %cst_19 : f32 to vector<1x128xf32>
    %25 = arith.subf %24, %23 : vector<1x128xf32>
    %26 = math.exp %25 : vector<1x128xf32>
    %cst_20 = arith.constant 1.000000e+00 : f32
    %27 = vector.broadcast %cst_20 : f32 to vector<1x128xf32>
    %28 = arith.addf %27, %26 : vector<1x128xf32>
    %29 = tpu.reciprocal %28 {approx = true} : vector<1x128xf32> -> vector<1x128xf32>
    %c0_21 = arith.constant 0 : index
    %c0_22 = arith.constant 0 : index
    %30 = vector.load %arg9[%c0_21, %c0_22] : memref<1x128xf32, #tpu.memory_space<vmem>>, vector<1x128xf32>
    tpu.vector_store %arg9[%c0_21, %c0_22], %29 {strides = array<i32>} : memref<1x128xf32, #tpu.memory_space<vmem>>, vector<1x128xf32>,
    return
  }
  func.func @transform_0(%arg0: i32) -> (i32, i32) {
    %c0_i32 = arith.constant 0 : i32
    %c0_i32_0 = arith.constant 0 : i32
    return %arg0, %c0_i32 : i32, i32
  }
  func.func @transform_1(%arg0: i32) -> (i32, i32) {
    %c0_i32 = arith.constant 0 : i32
    %c0_i32_0 = arith.constant 0 : i32
    %c0_i32_1 = arith.constant 0 : i32
    return %c0_i32, %c0_i32_0 : i32, i32
  }
  func.func @transform_2(%arg0: i32) -> (i32, i32) {
    %c0_i32 = arith.constant 0 : i32
    %c0_i32_0 = arith.constant 0 : i32
    %c0_i32_1 = arith.constant 0 : i32
    return %c0_i32, %c0_i32_0 : i32, i32
  }
  func.func @transform_3(%arg0: i32) -> (i32, i32) {
    %c0_i32 = arith.constant 0 : i32
    %c0_i32_0 = arith.constant 0 : i32
    %c0_i32_1 = arith.constant 0 : i32
    return %c0_i32, %c0_i32_0 : i32, i32
  }
  func.func @transform_4(%arg0: i32) -> (i32, i32) {
    %c0_i32 = arith.constant 0 : i32
    %c0_i32_0 = arith.constant 0 : i32
    %c0_i32_1 = arith.constant 0 : i32
    return %c0_i32, %c0_i32_0 : i32, i32
  }
  func.func @transform_5(%arg0: i32) -> (i32, i32) {
    %c0_i32 = arith.constant 0 : i32
    %c0_i32_0 = arith.constant 0 : i32
    %c0_i32_1 = arith.constant 0 : i32
    return %c0_i32, %c0_i32_0 : i32, i32
  }
  func.func @transform_6(%arg0: i32) -> (i32, i32) {
    %c0_i32 = arith.constant 0 : i32
    %c0_i32_0 = arith.constant 0 : i32
    %c0_i32_1 = arith.constant 0 : i32
    return %c0_i32, %c0_i32_0 : i32, i32
  }
  func.func @transform_7(%arg0: i32) -> (i32, i32) {
    %c0_i32 = arith.constant 0 : i32
    %c0_i32_0 = arith.constant 0 : i32
    %c0_i32_1 = arith.constant 0 : i32
    return %c0_i32, %c0_i32_0 : i32, i32
  }
  func.func @transform_8(%arg0: i32) -> (i32, i32) {
    %c0_i32 = arith.constant 0 : i32
    %c0_i32_0 = arith.constant 0 : i32
    return %arg0, %c0_i32 : i32, i32
  }
}

</mosaic_0001>

<bundles_post_ra>
// kernel: tpu_custom_call.1
= control target key start
LH: loop header
LB: loop body
LE: loop exit
PB: predicated region body
PF: predicated region fallthrough
CT: control target
= control target key end

     0   :  { %vm62_vm0 = vcmask 408576   ;;  %vm111_vm1 = vcmask 1041408   ;;  %s1265_s0 = inlined_call_operand.vmem [shape: f32[128,50], index: 0, kind: input, shape index: {}]   ;;  %s1266_s1 = inlined_call_operand.vmem [shape: f32[50,50], index: 1, kind: input, shape index: {}]   ;;  %s1267_s2 = inlined_call_operand.vmem [shape: f32[1,50], index: 2, kind: input, shape index: {}]   ;;  %s1268_s3 = inlined_call_operand.vmem [shape: f32[50,100], index: 3, kind: input, shape index: {}]   ;;  %s1269_s4 = inlined_call_operand.vmem [shape: f32[1,100], index: 4, kind: input, shape index: {}]   ;;  %s1270_s5 = inlined_call_operand.vmem [shape: f32[1,100], index: 5, kind: input, shape index: {}]   ;;  %s1271_s6 = inlined_call_operand.<no memory space> [shape: f32[1,1], index: 6, kind: input, shape index: {}]   ;;  %s1272_s7 = inlined_call_operand.<no memory space> [shape: f32[1,1], index: 7, kind: input, shape index: {}]   ;;  %s1273_s8 = inlined_call_operand.hbm [shape: f32[1,128], index: 8, kind: output, shape index: {}]  }
   0x1   :  { %v48_v0 = vld [vmem:[%s1266_s1] sm:$0xff]  ;;  %v49_v1 = vld [vmem:[%s1266_s1 + $0x8] sm:$0xff]  ;;  %v50_v2 = vld [vmem:[%s1266_s1 + $0x10] sm:$0xff] }
   0x2   :  { %v908_v3 = vpack.c.bf16 %v49_v1, %v48_v0  ;;  %v51_v4 = vld [vmem:[%s1266_s1 + $0x18] sm:$0xff]  ;;  %v52_v6 = vld [vmem:[%s1266_s1 + $0x20] sm:$0xff]  ;;  %v53_v7 = vld [vmem:[%s1266_s1 + $0x28] sm:$0xff] }
   0x3   :  { %v912_v5 = vpack.c.bf16 %v51_v4, %v50_v2  ;;  %v32_v8 = vld [vmem:[%s1265_s0] sm:$0xff]  ;;  %v916_v9 = vpack.c.bf16 %v53_v7, %v52_v6  ;;  %v54_v10 = vld [vmem:[%s1266_s1 + $0x30] sm:$0x3]  ;;  %v277_v12 = vld [vmem:[%s1268_s3 + $0x8] sm:$0xff] }
   0x4   :  { %909 = vmatprep.subr.bf16.mxu1 %v908_v3  ;;  %811 = vmatprep.mubr.msk.f32.mxu1 %vm62_vm0, %v32_v8  ;;  %v276_v11 = vld [vmem:[%s1268_s3] sm:$0xff] }
   0x5   :  { %911 = vmatpush3.bf16.msra.mxu1 %v908_v3 }
   0x6   :  { %913 = vmatprep.subr.bf16.mxu1 %v912_v5 }
   0x9   :  { %915 = vmatpush3.bf16.msra.mxu1 %v912_v5 }
   0xa   :  { %917 = vmatprep.subr.bf16.mxu1 %v916_v9 }
   0xb   :  { %15 = vsyncpa [#allocation5], 0  ;;  %v278_v13 = vld [vmem:[%s1268_s3 + $0x10] sm:$0xff]  ;;  %v279_v14 = vld [vmem:[%s1268_s3 + $0x18] sm:$0xff]  ;;  %v920_v15 = vpack.c.bf16 %v277_v12, %v276_v11  ;;  %vm997_vm2 = vmmov 0   ;;  %vm539_vm4 = vcmask 818176  }
   0xc   :  { %v33_v16 = vld [vmem:[%s1265_s0 + $0x8] sm:$0xff]  ;;  %v34_v17 = vld [vmem:[%s1265_s0 + $0x10] sm:$0xff]  ;;  %v924_v18 = vpack.c.bf16 %v279_v14, %v278_v13  ;;  %v280_v19 = vld [vmem:[%s1268_s3 + $0x20] sm:$0xff]  ;;  %s999_s24 = smov [#allocation4]  }
   0xd   :  { %919 = vmatpush3.bf16.msra.mxu1 %v916_v9  ;;  %v281_v20 = vld [vmem:[%s1268_s3 + $0x28] sm:$0xff]  ;;  %v35_v21 = vld [vmem:[%s1265_s0 + $0x18] sm:$0xff]  ;;  %v36_v22 = vld [vmem:[%s1265_s0 + $0x20] sm:$0xff]  ;;  %s673_s25 = sshll.u32 %s999_s24, 4  ;;  %s674_s25 = int_to_ptr.vmem [resolvable:$true] %s673_s25 }
   0xe   :  { %809 = vmatprep.subr.msk.mxu1 %vm111_vm1, %v54_v10  ;;  %v928_v23 = vpack.c.bf16 %v281_v20, %v280_v19  ;;  %v37_v24 = vld [vmem:[%s1265_s0 + $0x28] sm:$0xff]  ;;  %v38_v25 = vld [vmem:[%s1265_s0 + $0x30] sm:$0xff]  ;;  %v39_v27 = vld [vmem:[%s1265_s0 + $0x38] sm:$0xff]  ;;  %s976_s26 = scalar_lea.vmem %s674_s25, 32  ;;  %p977_p1 = scmp.lt.s32.totalorder %s674_s25, %s674_s25 }
   0xf   :  { %v282_v26 = vld [vmem:[%s1268_s3 + $0x30] sm:$0x3]  ;;  %v40_v28 = vld [vmem:[%s1265_s0 + $0x40] sm:$0xff]  ;;  %v41_v29 = vld [vmem:[%s1265_s0 + $0x48] sm:$0xff] }
  0x10   :  { %v42_v30 = vld [vmem:[%s1265_s0 + $0x50] sm:$0xff]  ;;  %v43_v31 = vld [vmem:[%s1265_s0 + $0x58] sm:$0xff]  ;;  %v44_v32 = vld [vmem:[%s1265_s0 + $0x60] sm:$0xff] }
  0x11   :  { %810 = vmatpush3.msk.msra.mxu1 %vm111_vm1, %v54_v10  ;;  %v45_v33 = vld [vmem:[%s1265_s0 + $0x68] sm:$0xff]  ;;  %v46_v34 = vld [vmem:[%s1265_s0 + $0x70] sm:$0xff]  ;;  %v47_v35 = vld [vmem:[%s1265_s0 + $0x78] sm:$0xff] }
  0x12   :  { %812 = vmatmul.mubr.msk.f32.vlgmr.msra.gmra.mrb[0].mxu1 %vm62_vm0, %v33_v16  ;;  %921 = vmatprep.subr.bf16.mxu1 %v920_v15  ;;  %v681_v36 = vld [vmem:[%s1267_s2] ss:$0 sm:$0xff]  ;;  %vm1193_vm6 = vmpackc.low %vm539_vm4, %vm539_vm4 }
  0x13   :  { %814 = vmatprep.mubr.msk.f32.mxu1 %vm62_vm0, %v34_v17  ;;  %923 = vmatpush3.bf16.msra.mxu1 %v920_v15 }
  0x14   :  { %925 = vmatprep.subr.bf16.mxu1 %v924_v18 }
  0x16   :  { %815 = vmatmul.mubr.msk.f32.gmra.mrb[2].mxu1 %vm62_vm0, %v35_v21  ;;  %v996_v21 = vmov 0.0|0.0  }
  0x17   :  { %817 = vmatprep.mubr.msk.f32.mxu1 %vm62_vm0, %v36_v22  ;;  %927 = vmatpush3.bf16.msra.mxu1 %v924_v18  ;;  %v998_v22 = vmov 0.0  }
  0x18   :  { %929 = vmatprep.subr.bf16.mxu1 %v928_v23  ;;  %932 = vmatprep.subr.bf16.mxu0 %v996_v21 }
  0x19   :  { %905 = vmatprep.mubr.msk.f32.mxu0 %vm997_vm2, %v998_v22 }
  0x1a   :  { %818 = vmatmul.mubr.msk.f32.gmra.mrb[4].mxu1 %vm62_vm0, %v37_v24 }
  0x1b   :  { %820 = vmatprep.mubr.msk.f32.mxu1 %vm62_vm0, %v38_v25  ;;  %931 = vmatpush3.bf16.msra.mxu1 %v928_v23  ;;  %v1178_v23 = vld [vmem:[%s1269_s4] ss:$0 sm:$0xff]  ;;  %v1183_v25 = vstv %s1272_s7 }
  0x1c   :  { %847 = vmatprep.subr.msk.mxu1 %vm111_vm1, %v282_v26 }
  0x1e   :  { %821 = vmatmul.mubr.msk.f32.gmra.mrb[6].mxu1 %vm62_vm0, %v39_v27 }
  0x1f   :  { %823 = vmatprep.mubr.msk.f32.mxu1 %vm62_vm0, %v40_v28  ;;  %848 = vmatpush3.msk.msra.mxu1 %vm111_vm1, %v282_v26 }
  0x22   :  { %824 = vmatmul.mubr.msk.f32.gmra.mrb[8].mxu1 %vm62_vm0, %v41_v29 }
  0x23   :  { %826 = vmatprep.mubr.msk.f32.mxu1 %vm62_vm0, %v42_v30 }
  0x26   :  { %827 = vmatmul.mubr.msk.f32.gmra.mrb[10].mxu1 %vm62_vm0, %v43_v31 }
  0x27   :  { %829 = vmatprep.mubr.msk.f32.mxu1 %vm62_vm0, %v44_v32 }
  0x2a   :  { %830 = vmatmul.mubr.msk.f32.gmra.mrb[12].mxu1 %vm62_vm0, %v45_v33 }
  0x2b   :  { %832 = vmatprep.mubr.msk.f32.mxu1 %vm62_vm0, %v46_v34 }
  0x2e   :  { %833 = vmatmul.mubr.msk.f32.gmra.mrb[14].mxu1 %vm62_vm0, %v47_v35 }
  0xe5   :  { %v813_v37 = vpop.f32.mrb[0].mxu1 }
  0xe6   :  { %v187_v38 = vadd.f32 %v813_v37, %v681_v36  ;;  %v181_v39 = vpop.f32.mrb[1].mxu1 }
  0xe7   :  { %v182_v40 = vadd.f32 %v681_v36, %v181_v39 }
  0xe8   :  { %v261_v43 = vmax.f32 %v187_v38, 0.0 }
  0xe9   :  { %v260_v41 = vmax.f32 %v182_v40, 0.0  ;;  %v816_v42 = vpop.f32.mrb[2].mxu1 }
  0xea   :  { %v197_v44 = vadd.f32 %v816_v42, %v681_v36  ;;  %v191_v45 = vpop.f32.mrb[3].mxu1 }
  0xeb   :  { %v192_v46 = vadd.f32 %v681_v36, %v191_v45  ;;  %849 = vmatprep.mubr.msk.f32.mxu1 %vm62_vm0, %v260_v41 }
  0xec   :  { %v263_v47 = vmax.f32 %v197_v44, 0.0  ;;  %850 = vmatmul.mubr.msk.f32.vlgmr.msra.gmra.mrb[16].mxu1 %vm62_vm0, %v261_v43 }
  0xed   :  { %v262_v48 = vmax.f32 %v192_v46, 0.0  ;;  %v819_v49 = vpop.f32.mrb[4].mxu1 }
  0xee   :  { %v207_v50 = vadd.f32 %v819_v49, %v681_v36  ;;  %v201_v51 = vpop.f32.mrb[5].mxu1 }
  0xef   :  { %852 = vmatprep.mubr.msk.f32.mxu1 %vm62_vm0, %v262_v48  ;;  %v202_v52 = vadd.f32 %v681_v36, %v201_v51 }
  0xf0   :  { %v265_v53 = vmax.f32 %v207_v50, 0.0  ;;  %853 = vmatmul.mubr.msk.f32.gmra.mrb[18].mxu1 %vm62_vm0, %v263_v47 }
  0xf1   :  { %v264_v54 = vmax.f32 %v202_v52, 0.0  ;;  %v822_v55 = vpop.f32.mrb[6].mxu1 }
  0xf2   :  { %v217_v56 = vadd.f32 %v822_v55, %v681_v36  ;;  %v211_v57 = vpop.f32.mrb[7].mxu1 }
  0xf3   :  { %855 = vmatprep.mubr.msk.f32.mxu1 %vm62_vm0, %v264_v54  ;;  %v212_v58 = vadd.f32 %v681_v36, %v211_v57 }
  0xf4   :  { %856 = vmatmul.mubr.msk.f32.gmra.mrb[20].mxu1 %vm62_vm0, %v265_v53  ;;  %v267_v59 = vmax.f32 %v217_v56, 0.0 }
  0xf5   :  { %v266_v60 = vmax.f32 %v212_v58, 0.0  ;;  %v825_v61 = vpop.f32.mrb[8].mxu1 }
  0xf6   :  { %v227_v62 = vadd.f32 %v825_v61, %v681_v36  ;;  %v221_v63 = vpop.f32.mrb[9].mxu1 }
  0xf7   :  { %858 = vmatprep.mubr.msk.f32.mxu1 %vm62_vm0, %v266_v60  ;;  %v222_v0 = vadd.f32 %v681_v36, %v221_v63 }
  0xf8   :  { %859 = vmatmul.mubr.msk.f32.gmra.mrb[22].mxu1 %vm62_vm0, %v267_v59  ;;  %v269_v1 = vmax.f32 %v227_v62, 0.0 }
  0xf9   :  { %v268_v2 = vmax.f32 %v222_v0, 0.0  ;;  %v828_v3 = vpop.f32.mrb[10].mxu1 }
  0xfa   :  { %v237_v4 = vadd.f32 %v828_v3, %v681_v36  ;;  %v231_v5 = vpop.f32.mrb[11].mxu1 }
  0xfb   :  { %861 = vmatprep.mubr.msk.f32.mxu1 %vm62_vm0, %v268_v2  ;;  %v232_v6 = vadd.f32 %v681_v36, %v231_v5 }
  0xfc   :  { %862 = vmatmul.mubr.msk.f32.gmra.mrb[24].mxu1 %vm62_vm0, %v269_v1  ;;  %v271_v7 = vmax.f32 %v237_v4, 0.0 }
  0xfd   :  { %v270_v8 = vmax.f32 %v232_v6, 0.0  ;;  %v831_v9 = vpop.f32.mrb[12].mxu1 }
  0xfe   :  { %v247_v10 = vadd.f32 %v831_v9, %v681_v36  ;;  %v241_v11 = vpop.f32.mrb[13].mxu1 }
  0xff   :  { %864 = vmatprep.mubr.msk.f32.mxu1 %vm62_vm0, %v270_v8  ;;  %v242_v12 = vadd.f32 %v681_v36, %v241_v11 }
 0x100   :  { %865 = vmatmul.mubr.msk.f32.gmra.mrb[26].mxu1 %vm62_vm0, %v271_v7  ;;  %v273_v13 = vmax.f32 %v247_v10, 0.0 }
 0x101   :  { %v272_v14 = vmax.f32 %v242_v12, 0.0  ;;  %v834_v15 = vpop.f32.mrb[14].mxu1 }
 0x102   :  { %v257_v16 = vadd.f32 %v834_v15, %v681_v36  ;;  %v251_v17 = vpop.f32.mrb[15].mxu1 }
 0x103   :  { %867 = vmatprep.mubr.msk.f32.mxu1 %vm62_vm0, %v272_v14  ;;  %v252_v18 = vadd.f32 %v681_v36, %v251_v17 }
 0x104   :  { %868 = vmatmul.mubr.msk.f32.gmra.mrb[28].mxu1 %vm62_vm0, %v273_v13  ;;  %v275_v19 = vmax.f32 %v257_v16, 0.0 }
 0x105   :  { %v274_v20 = vmax.f32 %v252_v18, 0.0 }
 0x107   :  { %870 = vmatprep.mubr.msk.f32.mxu1 %vm62_vm0, %v274_v20 }
 0x108   :  { %871 = vmatmul.mubr.msk.f32.gmra.mrb[30].mxu1 %vm62_vm0, %v275_v19 }
 0x1bf   :  { %v851_v24 = vpop.f32.mrb[16].mxu1 }
 0x1c0   :  { %v413_v26 = vadd.f32 %v851_v24, %v1178_v23  ;;  %v407_v27 = vpop.f32.mrb[17].mxu1 }
 0x1c1   :  { %v408_v28 = vadd.f32 %v1178_v23, %v407_v27 }
 0x1c2   :  { %vm488_vm3 = vcmp.gt.f32.partialorder %v413_v26, 0.0  ;;  %v505_v29 = vmul.f32 %v1183_v25, %v413_v26 }
 0x1c3   :  { %vm487_vm5 = vcmp.gt.f32.partialorder %v408_v28, 0.0  ;;  %v504_v30 = vmul.f32 %v1183_v25, %v408_v28  ;;  %v854_v31 = vpop.f32.mrb[18].mxu1 }
 0x1c4   :  { %v423_v32 = vadd.f32 %v854_v31, %v1178_v23  ;;  %v417_v33 = vpop.f32.mrb[19].mxu1  ;;  %v521_v34 = vsel %vm488_vm3, %v413_v26, %v505_v29 }
 0x1c5   :  { %v418_v35 = vadd.f32 %v1178_v23, %v417_v33  ;;  %v520_v36 = vsel %vm487_vm5, %v408_v28, %v504_v30 }
 0x1c6   :  { %vm490_vm7 = vcmp.gt.f32.partialorder %v423_v32, 0.0  ;;  %v507_v38 = vmul.f32 %v1183_v25, %v423_v32  ;;  %v933_v39 = vpack.c.bf16 %v521_v34, %v520_v36 }
 0x1c7   :  { %vm489_vm8 = vcmp.gt.f32.partialorder %v418_v35, 0.0  ;;  %v506_v40 = vmul.f32 %v1183_v25, %v418_v35  ;;  %v857_v41 = vpop.f32.mrb[20].mxu1 }
 0x1c8   :  { %v523_v42 = vsel %vm490_vm7, %v423_v32, %v507_v38  ;;  %935 = vmatpush3.bf16.xpose.msk.msra.mxu0 %vm1193_vm6, %v933_v39  ;;  %v433_v43 = vadd.f32 %v857_v41, %v1178_v23  ;;  %v427_v44 = vpop.f32.mrb[21].mxu1 }
 0x1c9   :  { %v522_v45 = vsel %vm489_vm8, %v418_v35, %v506_v40  ;;  %v428_v46 = vadd.f32 %v1178_v23, %v427_v44  ;;  %936 = vmatprep.subr.bf16.mxu0 %v996_v21 }
 0x1ca   :  { %v937_v47 = vpack.c.bf16 %v523_v42, %v522_v45  ;;  %vm492_vm9 = vcmp.gt.f32.partialorder %v433_v43, 0.0  ;;  %v509_v48 = vmul.f32 %v1183_v25, %v433_v43 }
 0x1cb   :  { %vm491_vm10 = vcmp.gt.f32.partialorder %v428_v46, 0.0  ;;  %v508_v49 = vmul.f32 %v1183_v25, %v428_v46  ;;  %v860_v50 = vpop.f32.mrb[22].mxu1 }
 0x1cc   :  { %v525_v51 = vsel %vm492_vm9, %v433_v43, %v509_v48  ;;  %v443_v52 = vadd.f32 %v860_v50, %v1178_v23  ;;  %v437_v53 = vpop.f32.mrb[23].mxu1 }
 0x1cd   :  { %v524_v54 = vsel %vm491_vm10, %v428_v46, %v508_v49  ;;  %v438_v55 = vadd.f32 %v1178_v23, %v437_v53 }
 0x1ce   :  { %v941_v56 = vpack.c.bf16 %v525_v51, %v524_v54  ;;  %vm494_vm11 = vcmp.gt.f32.partialorder %v443_v52, 0.0  ;;  %v511_v57 = vmul.f32 %v1183_v25, %v443_v52 }
 0x1cf   :  { %vm493_vm12 = vcmp.gt.f32.partialorder %v438_v55, 0.0  ;;  %v510_v58 = vmul.f32 %v1183_v25, %v438_v55  ;;  %v863_v59 = vpop.f32.mrb[24].mxu1 }
 0x1d0   :  { %939 = vmatpush3.bf16.xpose.msk.msra.mxu0 %vm1193_vm6, %v937_v47  ;;  %v527_v60 = vsel %vm494_vm11, %v443_v52, %v511_v57  ;;  %v453_v61 = vadd.f32 %v863_v59, %v1178_v23  ;;  %v447_v62 = vpop.f32.mrb[25].mxu1 }
 0x1d1   :  { %v526_v63 = vsel %vm493_vm12, %v438_v55, %v510_v58  ;;  %940 = vmatprep.subr.bf16.mxu0 %v996_v21  ;;  %v448_v0 = vadd.f32 %v1178_v23, %v447_v62 }
 0x1d2   :  { %v945_v1 = vpack.c.bf16 %v527_v60, %v526_v63  ;;  %vm496_vm13 = vcmp.gt.f32.partialorder %v453_v61, 0.0  ;;  %v513_v2 = vmul.f32 %v1183_v25, %v453_v61 }
 0x1d3   :  { %vm495_vm14 = vcmp.gt.f32.partialorder %v448_v0, 0.0  ;;  %v512_v3 = vmul.f32 %v1183_v25, %v448_v0  ;;  %v866_v4 = vpop.f32.mrb[26].mxu1 }
 0x1d4   :  { %v529_v5 = vsel %vm496_vm13, %v453_v61, %v513_v2  ;;  %v463_v6 = vadd.f32 %v866_v4, %v1178_v23  ;;  %v457_v7 = vpop.f32.mrb[27].mxu1 }
 0x1d5   :  { %v528_v8 = vsel %vm495_vm14, %v448_v0, %v512_v3  ;;  %v458_v9 = vadd.f32 %v1178_v23, %v457_v7 }
 0x1d6   :  { %v949_v10 = vpack.c.bf16 %v529_v5, %v528_v8  ;;  %vm498_vm15 = vcmp.gt.f32.partialorder %v463_v6, 0.0  ;;  %v515_v11 = vmul.f32 %v1183_v25, %v463_v6 }
 0x1d7   :  { %vm497_vm0 = vcmp.gt.f32.partialorder %v458_v9, 0.0  ;;  %v514_v12 = vmul.f32 %v1183_v25, %v458_v9  ;;  %v869_v13 = vpop.f32.mrb[28].mxu1 }
 0x1d8   :  { %943 = vmatpush3.bf16.xpose.msk.msra.mxu0 %vm1193_vm6, %v941_v56  ;;  %v531_v14 = vsel %vm498_vm15, %v463_v6, %v515_v11  ;;  %v473_v15 = vadd.f32 %v869_v13, %v1178_v23  ;;  %v467_v16 = vpop.f32.mrb[29].mxu1 }
 0x1d9   :  { %944 = vmatprep.subr.bf16.mxu0 %v996_v21  ;;  %v530_v17 = vsel %vm497_vm0, %v458_v9, %v514_v12  ;;  %v468_v18 = vadd.f32 %v1178_v23, %v467_v16 }
 0x1da   :  { %v953_v19 = vpack.c.bf16 %v531_v14, %v530_v17  ;;  %vm500_vm1 = vcmp.gt.f32.partialorder %v473_v15, 0.0  ;;  %v517_v20 = vmul.f32 %v1183_v25, %v473_v15 }
 0x1db   :  { %vm499_vm2 = vcmp.gt.f32.partialorder %v468_v18, 0.0  ;;  %v516_v22 = vmul.f32 %v1183_v25, %v468_v18  ;;  %v872_v24 = vpop.f32.mrb[30].mxu1 }
 0x1dc   :  { %v533_v26 = vsel %vm500_vm1, %v473_v15, %v517_v20  ;;  %v483_v27 = vadd.f32 %v872_v24, %v1178_v23  ;;  %v477_v28 = vpop.f32.mrb[31].mxu1 }
 0x1dd   :  { %v532_v29 = vsel %vm499_vm2, %v468_v18, %v516_v22  ;;  %v478_v30 = vadd.f32 %v1178_v23, %v477_v28  ;;  %v536_v23 = vld [vmem:[%s1270_s5] sm:$0x1]  ;;  %s972_s5 = scalar_lea.vmem %s674_s25, 16 }
 0x1de   :  { %v957_v31 = vpack.c.bf16 %v533_v26, %v532_v29  ;;  %vm502_vm3 = vcmp.gt.f32.partialorder %v483_v27, 0.0  ;;  %v519_v32 = vmul.f32 %v1183_v25, %v483_v27  ;;  %p973_p0 = scmp.ne.s32.totalorder %s674_s25, %s972_s5  ;;  %p978_p2 = scmp.lt.s32.totalorder %s976_s26, %s972_s5 }
 0x1df   :  { %vm501_vm5 = vcmp.gt.f32.partialorder %v478_v30, 0.0  ;;  %v518_v33 = vmul.f32 %v1183_v25, %v478_v30  ;;  %v538_v25 = vstv %s1271_s6 }
 0x1e0   :  { %947 = vmatpush3.bf16.xpose.msk.msra.mxu0 %vm1193_vm6, %v945_v1  ;;  %v535_v34 = vsel %vm502_vm3, %v483_v27, %v519_v32  ;;  %p979_p3 = por %p978_p2, %p977_p1 }
 0x1e1   :  { %948 = vmatprep.subr.bf16.mxu0 %v996_v21  ;;  %v534_v35 = vsel %vm501_vm5, %v478_v30, %v518_v33 }
 0x1e2   :  { %v961_v36 = vpack.c.bf16 %v535_v34, %v534_v35  ;;  %p980_p4 = pnand %p979_p3, %p973_p0 }
 0x1e8   :  { %951 = vmatpush3.bf16.xpose.msk.msra.mxu0 %vm1193_vm6, %v949_v10 }
 0x1e9   :  { %952 = vmatprep.subr.bf16.mxu0 %v996_v21 }
 0x1f0   :  { %955 = vmatpush3.bf16.xpose.msk.msra.mxu0 %vm1193_vm6, %v953_v19 }
 0x1f1   :  { %956 = vmatprep.subr.bf16.mxu0 %v996_v21 }
 0x1f8   :  { %959 = vmatpush3.bf16.xpose.msk.msra.mxu0 %vm1193_vm6, %v957_v31 }
 0x1f9   :  { %960 = vmatprep.subr.bf16.mxu0 %v996_v21 }
 0x200   :  { %963 = vmatpush3.bf16.xpose.msk.msra.mxu0 %vm1193_vm6, %v961_v36 }
 0x207   :  { %906 = vmatmul.mubr.msk.f32.vlgmr.msra.gmra.mrb[0].mxu0 %vm539_vm4, %v536_v23 }
 0x2da   :  { %v657_v38 = vpop.f32.mrb[0].mxu0 }
 0x2db   :  { %v658_v39 = vadd.f32 %v657_v38, %v538_v25  ;;  %v907_v40 = vpop.f32.mrb[1].mxu0 }
 0x2dd   :  { %v661_v41 = vsub.f32 0.0, %v658_v39 }
 0x2df   :  { %v662_v42 = vmul.f32 1.442695, %v661_v41 }
 0x2e1   :  { %968 = vpow2.f32 %v662_v42 }
 0x2eb   :  { %v969_v21 = vpop.eup %968 }
 0x2ec   :  { %v664_v43 = vadd.f32 1.0, %v969_v21 }
 0x2ee   :  { %970 = vrcp.f32 %v664_v43 }
 0x2f8   :  { %v971_v37 = vpop.eup %970 }
 0x2f9   :  { %666 = vst [vmem:[#allocation4] sm:$0x1] %v971_v37 }
 0x2fa   :  { %983 = shalt.err (!%p980_p4)
}
 0x2fb   :  { %s984_s3 = scalar_lea.hbm %s1273_s8, 16 }
 0x2fc   :  { %p985_p5 = scmp.ne.s32.totalorder %s1273_s8, %s984_s3  ;;  %p988_p6 = scmp.lt.u32.totalorder %s984_s3, %s1273_s8 }
 0x2fe   :  { %p990_p7 = pnand %p988_p6, %p985_p5 }
 0x300   :  { %993 = shalt.err (!%p990_p7)
}
 0x301   :  { %676 = dma.vmem_to_hbm [thread:$0]  %s674_s25, 16, %s1273_s8, [#allocation5]  }
 0x302   :  { %994 = dma.done.wait [#allocation5], 16  }
 0x303   :  { %995 = vsyncadd [#allocation5], 4294967280 }
 0x304   :  { %680 = vsyncpa [#allocation5], 1 }

</bundles_post_ra>
